<compile_context>
chip_gen: v6e
topology: v6e:2x2x1
jax: 0.10.0
libtpu: 0.0.40
codegen_flags: <defaults>
</compile_context>

<pallas_src>
import functools
import math

import jax
import jax.numpy as jnp
from jax.experimental import pallas as pl
from jax.experimental.pallas import tpu as pltpu


def _round_up(x, m):
    return (x + m - 1) // m * m


def _cdiv(a, b):
    return (a + b - 1) // b


def _gelu_exact(x):
    # torch nn.GELU() default is the exact erf form.
    return 0.5 * x * (1.0 + jax.lax.erf(x * (1.0 / math.sqrt(2.0))))


def _layernorm_f32(x, gamma, beta, eps):
    x = x.astype(jnp.float32)
    mu = jnp.mean(x, axis=-1, keepdims=True)
    var = jnp.mean((x - mu) ** 2, axis=-1, keepdims=True)
    return (x - mu) * jax.lax.rsqrt(var + eps) * gamma + beta


# ----------------------------------------------------------------------------
# Kernel: grid = (row_tiles, vocab_tiles); vocab axis innermost ("arbitrary").
# ----------------------------------------------------------------------------
def _lm_head_kernel(x_ref, wt_ref, bt_ref, g_ref, b_ref, wd_ref, bd_ref,
                    out_ref, t_ref, *, eps):
    # Transform computed once per row tile and cached in VMEM scratch (bf16)
    # for reuse across the whole vocab sweep.
    @pl.when(pl.program_id(1) == 0)
    def _():
        h = jnp.dot(x_ref[...], wt_ref[...],
                    preferred_element_type=jnp.float32)          # (tm, H) f32
        h = h + bt_ref[...]
        h = _gelu_exact(h)
        h = _layernorm_f32(h, g_ref[...], b_ref[...], eps)
        t_ref[...] = h.astype(jnp.bfloat16)

    # Lane-dense (tm, tv) output tile: bf16 MXU matmul, f32 accumulation + bias.
    out_ref[...] = (
        jnp.dot(t_ref[...], wd_ref[...], preferred_element_type=jnp.float32)
        + bd_ref[...]).astype(out_ref.dtype)


# ----------------------------------------------------------------------------
# Tile selection / VMEM accounting
# ----------------------------------------------------------------------------
def _footprint_bytes(tm, tv, H, out_itemsize):
    return (2 * tm * H * 2          # x tile, bf16, double-buffered
            + 2 * H * H * 2         # transform weight, bf16, double-buffered
            + 2 * 3 * H * 4         # bt / gamma / beta, f32, double-buffered
            + 2 * H * tv * 2        # decoder weight tile, bf16, double-buffered
            + 2 * tv * 4            # decoder bias tile, f32, double-buffered
            + 2 * tm * tv * out_itemsize   # output tile, double-buffered
            + tm * H * 2)           # transform scratch, bf16


def _choose_tiles(M, H, V, out_itemsize, vmem_budget_bytes):
    # Vocab tile: lane-dense, as wide as reasonable (amortizes per-step cost).
    tv = min(2048, _round_up(V, 128))

    # Row tile: as large as the budget allows (multiple of 256 for the MXU),
    # capped so that M yields at least 2 row tiles when M is large enough
    # (keeps both v7x TensorCores busy on the "parallel" axis).
    if M >= 512:
        tm = min(1024, _round_up(_cdiv(M, 2), 256))
    else:
        tm = min(1024, max(16, _round_up(M, 8)))

    while tm > 16 and _footprint_bytes(tm, tv, H, out_itemsize) > vmem_budget_bytes:
        tm = tm - 256 if tm > 256 else _round_up(max(16, tm // 2), 8)
    while tv > 128 and _footprint_bytes(tm, tv, H, out_itemsize) > vmem_budget_bytes:
        tv = _round_up(max(128, tv // 2), 128)
    return tm, tv


# ----------------------------------------------------------------------------
# Parameter preparation (hoisted, one-time): bf16 matmul weights, f32 LN/bias.
# ----------------------------------------------------------------------------
def prepare_params(raw):
    return {
        "wt": raw["wt"].astype(jnp.bfloat16),    # (H, H)  dense weight (W.T)
        "bt": raw["bt"].astype(jnp.float32),     # (1, H)
        "g":  raw["g"].astype(jnp.float32),      # (1, H)  LayerNorm gamma
        "b":  raw["b"].astype(jnp.float32),      # (1, H)  LayerNorm beta
        "wd": raw["wd"].astype(jnp.bfloat16),    # (H, V)  decoder weight (W.T)
        "bd": raw["bd"].astype(jnp.float32),     # (1, V)
    }


def layer_decoder_forward(encoder_output, params, *, eps=1e-12,
                          tm=None, tv=None,
                          out_dtype=jnp.float32,
                          vmem_budget_bytes=48 * 1024 * 1024,
                          vmem_limit_bytes=None):
    """encoder_output: (B, S, H) -> logits (B, S, V) in out_dtype."""
    B, S, H = encoder_output.shape
    V = params["wd"].shape[1]
    M = B * S

    out_itemsize = jnp.dtype(out_dtype).itemsize
    auto_tm, auto_tv = _choose_tiles(M, H, V, out_itemsize, vmem_budget_bytes)
    if tm is None:
        tm = auto_tm
    if tv is None:
        tv = auto_tv

    if vmem_limit_bytes is None:
        fp = _footprint_bytes(tm, tv, H, out_itemsize)
        vmem_limit_bytes = int(min(96 * 1024 * 1024,
                                   max(32 * 1024 * 1024, 3 * fp // 2)))

    # Activation handed in as bf16; weight casts below are no-ops when params
    # came from prepare_params() (the fast path) and only exist as a fallback
    # for raw f32 params.
    x2 = encoder_output.reshape(M, H).astype(jnp.bfloat16)
    wt = params["wt"].astype(jnp.bfloat16)
    bt = params["bt"].astype(jnp.float32)
    g = params["g"].astype(jnp.float32)
    b = params["b"].astype(jnp.float32)
    wd = params["wd"].astype(jnp.bfloat16)
    bd = params["bd"].astype(jnp.float32)

    grid = (pl.cdiv(M, tm), pl.cdiv(V, tv))
    kernel = functools.partial(_lm_head_kernel, eps=eps)

    out = pl.pallas_call(
        kernel,
        out_shape=jax.ShapeDtypeStruct((M, V), out_dtype),
        grid=grid,
        in_specs=[
            pl.BlockSpec((tm, H), lambda i, j: (i, 0)),    # activation row tile
            # NOTE: wt/bt/g/b are grid-invariant (DMA'd once); default 2-deep
            # buffering costs a little extra VMEM but is kept for robustness.
            pl.BlockSpec((H, H), lambda i, j: (0, 0)),     # transform weight
            pl.BlockSpec((1, H), lambda i, j: (0, 0)),     # transform bias
            pl.BlockSpec((1, H), lambda i, j: (0, 0)),     # LN gamma
            pl.BlockSpec((1, H), lambda i, j: (0, 0)),     # LN beta
            pl.BlockSpec((H, tv), lambda i, j: (0, j)),    # decoder weight tile
            pl.BlockSpec((1, tv), lambda i, j: (0, j)),    # decoder bias tile
        ],
        out_specs=pl.BlockSpec((tm, tv), lambda i, j: (i, j)),
        scratch_shapes=[pltpu.VMEM((tm, H), jnp.bfloat16)],
        compiler_params=pltpu.CompilerParams(
            dimension_semantics=("parallel", "arbitrary"),
            vmem_limit_bytes=vmem_limit_bytes),
    )(x2, wt, bt, g, b, wd, bd)

    return out.reshape(B, S, V)


# ----------------------------------------------------------------------------
# Pure-JAX reference (f32) for correctness checking
# ----------------------------------------------------------------------------
def layer_decoder_reference(x, p, eps):
    h = jnp.einsum("bsh,hk->bsk", x, p["wt"]) + p["bt"]
    h = _gelu_exact(h)
    mu = jnp.mean(h, axis=-1, keepdims=True)
    var = jnp.mean((h - mu) ** 2, axis=-1, keepdims=True)
    h = (h - mu) * jax.lax.rsqrt(var + eps) * p["g"] + p["b"]
    return jnp.einsum("bsh,hv->bsv", h, p["wd"]) + p["bd"]


def init_params(key, hidden_size, vocab_size):
    H, V = hidden_size, vocab_size
    k = jax.random.split(key, 6)
    s = 0.02
    return {
        "wt": (s * jax.random.normal(k[0], (H, H))).astype(jnp.float32),  # dense W.T
        "bt": (s * jax.random.normal(k[1], (1, H))).astype(jnp.float32),
        "g": (1.0 + 0.1 * jax.random.normal(k[2], (1, H))).astype(jnp.float32),
        "b": (0.1 * jax.random.normal(k[3], (1, H))).astype(jnp.float32),
        "wd": (s * jax.random.normal(k[4], (H, V))).astype(jnp.float32),  # decoder W.T
        "bd": (s * jax.random.normal(k[5], (1, V))).astype(jnp.float32),
    }


# ----------------------------------------------------------------------------
if __name__ == "__main__":
    H, V = 32, 256          # hidden_size, vocab_size
    B, S = 2, 16
    eps = 1e-12

    key = jax.random.PRNGKey(0)
    pkey, xkey = jax.random.split(key)
    raw_params = init_params(pkey, H, V)
    params = prepare_params(raw_params)          # one-time bf16 cast (hoisted)
    encoder_output = jax.random.normal(xkey, (B, S, H), dtype=jnp.float32)

    ref = layer_decoder_reference(encoder_output, raw_params, eps)

    # Explicit small tiles: tm=16 (bf16 sublane-packed), tv=128 (lane-dense)
    # -> grid (2, 2): exercises both the parallel row axis and the vocab sweep
    # with the cached transform, with no padding anywhere.
    fwd = jax.jit(functools.partial(layer_decoder_forward, eps=eps, tm=16, tv=128))
    out = jax.block_until_ready(fwd(encoder_output, params))
    assert out.shape == (B, S, V)
    assert bool(jnp.all(jnp.isfinite(out)))
    max_err = float(jnp.max(jnp.abs(out - ref)))
    assert max_err < 1e-2, f"max abs err {max_err}"

    # Auto-tiled (production default) path.
    fwd_auto = jax.jit(functools.partial(layer_decoder_forward, eps=eps))
    out_auto = jax.block_until_ready(fwd_auto(encoder_output, params))
    max_err_auto = float(jnp.max(jnp.abs(out_auto - ref)))
    assert max_err_auto < 1e-2, f"max abs err (auto tiles) {max_err_auto}"

    print("KERNEL_OK")
</pallas_src>

<mosaic_0001>
module attributes {stable_mosaic.version = 11 : i64} {
  func.func @_lm_head_kernel(%arg0: i32, %arg1: i32, %arg2: memref<16x32xbf16, #tpu.memory_space<vmem>>, %arg3: memref<32x32xbf16, #tpu.memory_space<vmem>>, %arg4: memref<1x32xf32, #tpu.memory_space<vmem>>, %arg5: memref<1x32xf32, #tpu.memory_space<vmem>>, %arg6: memref<1x32xf32, #tpu.memory_space<vmem>>, %arg7: memref<32x128xbf16, #tpu.memory_space<vmem>>, %arg8: memref<1x128xf32, #tpu.memory_space<vmem>>, %arg9: memref<16x128xf32, #tpu.memory_space<vmem>>, %arg10: memref<16x32xbf16, #tpu.memory_space<vmem>>) attributes {dimension_semantics = [#tpu.dimension_semantics<parallel>, #tpu.dimension_semantics<arbitrary>], iteration_bounds = array<i64: 2, 2>, scalar_prefetch = 0 : i64, scratch_operands = 1 : i64, tpu.core_type = #tpu.core_type<tc>, window_params = [{transform_indices = @transform_0, window_bounds = array<i64: 16, 32>}, {pipeline_mode = #tpu.pipeline_mode<synchronous>, transform_indices = @transform_1, window_bounds = array<i64: 32, 32>}, {pipeline_mode = #tpu.pipeline_mode<synchronous>, transform_indices = @transform_2, window_bounds = array<i64: 1, 32>}, {pipeline_mode = #tpu.pipeline_mode<synchronous>, transform_indices = @transform_3, window_bounds = array<i64: 1, 32>}, {pipeline_mode = #tpu.pipeline_mode<synchronous>, transform_indices = @transform_4, window_bounds = array<i64: 1, 32>}, {transform_indices = @transform_5, window_bounds = array<i64: 32, 128>}, {transform_indices = @transform_6, window_bounds = array<i64: 1, 128>}, {transform_indices = @transform_7, window_bounds = array<i64: 16, 128>}]} {
    %c0_i32 = arith.constant 0 : i32
    %0 = arith.cmpi eq, %arg1, %c0_i32 : i32
    %1 = arith.extui %0 : i1 to i32
    %c0_i32_0 = arith.constant 0 : i32
    %2 = arith.cmpi ne, %1, %c0_i32_0 : i32
    scf.if %2 {
      %c0_8 = arith.constant 0 : index
      %c0_9 = arith.constant 0 : index
      %10 = vector.load %arg2[%c0_8, %c0_9] : memref<16x32xbf16, #tpu.memory_space<vmem>>, vector<16x32xbf16>
      %c0_10 = arith.constant 0 : index
      %c0_11 = arith.constant 0 : index
      %11 = vector.load %arg3[%c0_10, %c0_11] : memref<32x32xbf16, #tpu.memory_space<vmem>>, vector<32x32xbf16>
      %cst_12 = arith.constant dense<0.000000e+00> : vector<16x32xf32>
      %12 = tpu.matmul %10, %11, %cst_12 {dimension_numbers = #tpu.dot_dimension_numbers<[1], [0], [0], [1], [0, 0, 1, 1], [], []>} : vector<16x32xbf16>, vector<32x32xbf16>, vector<16x32xf32> -> vector<16x32xf32>
      %c0_13 = arith.constant 0 : index
      %c0_14 = arith.constant 0 : index
      %13 = vector.load %arg4[%c0_13, %c0_14] : memref<1x32xf32, #tpu.memory_space<vmem>>, vector<1x32xf32>
      %14 = vector.broadcast %13 : vector<1x32xf32> to vector<16x32xf32>
      %15 = arith.addf %12, %14 : vector<16x32xf32>
      %cst_15 = arith.constant 5.000000e-01 : f32
      %16 = vector.broadcast %cst_15 : f32 to vector<16x32xf32>
      %17 = arith.mulf %16, %15 : vector<16x32xf32>
      %cst_16 = arith.constant 0.707106769 : f32
      %18 = vector.broadcast %cst_16 : f32 to vector<16x32xf32>
      %19 = arith.mulf %15, %18 : vector<16x32xf32>
      %20 = math.erf %19 : vector<16x32xf32>
      %cst_17 = arith.constant 1.000000e+00 : f32
      %21 = vector.broadcast %cst_17 : f32 to vector<16x32xf32>
      %22 = arith.addf %21, %20 : vector<16x32xf32>
      %23 = arith.mulf %17, %22 : vector<16x32xf32>
      %c0_18 = arith.constant 0 : index
      %c0_19 = arith.constant 0 : index
      %24 = vector.load %arg5[%c0_18, %c0_19] : memref<1x32xf32, #tpu.memory_space<vmem>>, vector<1x32xf32>
      %c0_20 = arith.constant 0 : index
      %c0_21 = arith.constant 0 : index
      %25 = vector.load %arg6[%c0_20, %c0_21] : memref<1x32xf32, #tpu.memory_space<vmem>>, vector<1x32xf32>
      %cst_22 = arith.constant dense<0.000000e+00> : vector<16xf32>
      %26 = vector.multi_reduction <add>, %23, %cst_22 [1] : vector<16x32xf32> to vector<16xf32>
      %27 = vector.shape_cast %26 : vector<16xf32> to vector<16x1xf32>
      %cst_23 = arith.constant 3.200000e+01 : f32
      %28 = vector.broadcast %cst_23 : f32 to vector<16x1xf32>
      %29 = arith.divf %27, %28 : vector<16x1xf32>
      %30 = vector.broadcast %29 : vector<16x1xf32> to vector<16x32xf32>
      %31 = arith.subf %23, %30 : vector<16x32xf32>
      %32 = arith.mulf %31, %31 : vector<16x32xf32>
      %cst_24 = arith.constant dense<0.000000e+00> : vector<16xf32>
      %33 = vector.multi_reduction <add>, %32, %cst_24 [1] : vector<16x32xf32> to vector<16xf32>
      %34 = vector.shape_cast %33 : vector<16xf32> to vector<16x1xf32>
      %cst_25 = arith.constant 3.200000e+01 : f32
      %35 = vector.broadcast %cst_25 : f32 to vector<16x1xf32>
      %36 = arith.divf %34, %35 : vector<16x1xf32>
      %37 = vector.broadcast %29 : vector<16x1xf32> to vector<16x32xf32>
      %38 = arith.subf %23, %37 : vector<16x32xf32>
      %cst_26 = arith.constant 9.99999996E-13 : f32
      %39 = vector.broadcast %cst_26 : f32 to vector<16x1xf32>
      %40 = arith.addf %36, %39 : vector<16x1xf32>
      %41 = math.rsqrt %40 : vector<16x1xf32>
      %42 = vector.broadcast %41 : vector<16x1xf32> to vector<16x32xf32>
      %43 = arith.mulf %38, %42 : vector<16x32xf32>
      %44 = vector.broadcast %24 : vector<1x32xf32> to vector<16x32xf32>
      %45 = arith.mulf %43, %44 : vector<16x32xf32>
      %46 = vector.broadcast %25 : vector<1x32xf32> to vector<16x32xf32>
      %47 = arith.addf %45, %46 : vector<16x32xf32>
      %48 = arith.truncf %47 : vector<16x32xf32> to vector<16x32xbf16>
      %c0_27 = arith.constant 0 : index
      %c0_28 = arith.constant 0 : index
      %49 = vector.load %arg10[%c0_27, %c0_28] : memref<16x32xbf16, #tpu.memory_space<vmem>>, vector<16x32xbf16>
      tpu.vector_store %arg10[%c0_27, %c0_28], %48 {strides = array<i32>} : memref<16x32xbf16, #tpu.memory_space<vmem>>, vector<16x32xbf16>,
    } else {
    }
    %c0 = arith.constant 0 : index
    %c0_1 = arith.constant 0 : index
    %3 = vector.load %arg10[%c0, %c0_1] : memref<16x32xbf16, #tpu.memory_space<vmem>>, vector<16x32xbf16>
    %c0_2 = arith.constant 0 : index
    %c0_3 = arith.constant 0 : index
    %4 = vector.load %arg7[%c0_2, %c0_3] : memref<32x128xbf16, #tpu.memory_space<vmem>>, vector<32x128xbf16>
    %cst = arith.constant dense<0.000000e+00> : vector<16x128xf32>
    %5 = tpu.matmul %3, %4, %cst {dimension_numbers = #tpu.dot_dimension_numbers<[1], [0], [0], [1], [0, 0, 1, 1], [], []>} : vector<16x32xbf16>, vector<32x128xbf16>, vector<16x128xf32> -> vector<16x128xf32>
    %c0_4 = arith.constant 0 : index
    %c0_5 = arith.constant 0 : index
    %6 = vector.load %arg8[%c0_4, %c0_5] : memref<1x128xf32, #tpu.memory_space<vmem>>, vector<1x128xf32>
    %7 = vector.broadcast %6 : vector<1x128xf32> to vector<16x128xf32>
    %8 = arith.addf %5, %7 : vector<16x128xf32>
    %c0_6 = arith.constant 0 : index
    %c0_7 = arith.constant 0 : index
    %9 = vector.load %arg9[%c0_6, %c0_7] : memref<16x128xf32, #tpu.memory_space<vmem>>, vector<16x128xf32>
    tpu.vector_store %arg9[%c0_6, %c0_7], %8 {strides = array<i32>} : memref<16x128xf32, #tpu.memory_space<vmem>>, vector<16x128xf32>,
    return
  }
  func.func @transform_0(%arg0: i32, %arg1: i32) -> (i32, i32) {
    %c0_i32 = arith.constant 0 : i32
    %c0_i32_0 = arith.constant 0 : i32
    return %arg0, %c0_i32 : i32, i32
  }
  func.func @transform_1(%arg0: i32, %arg1: i32) -> (i32, i32) {
    %c0_i32 = arith.constant 0 : i32
    %c0_i32_0 = arith.constant 0 : i32
    %c0_i32_1 = arith.constant 0 : i32
    return %c0_i32, %c0_i32_0 : i32, i32
  }
  func.func @transform_2(%arg0: i32, %arg1: i32) -> (i32, i32) {
    %c0_i32 = arith.constant 0 : i32
    %c0_i32_0 = arith.constant 0 : i32
    %c0_i32_1 = arith.constant 0 : i32
    return %c0_i32, %c0_i32_0 : i32, i32
  }
  func.func @transform_3(%arg0: i32, %arg1: i32) -> (i32, i32) {
    %c0_i32 = arith.constant 0 : i32
    %c0_i32_0 = arith.constant 0 : i32
    %c0_i32_1 = arith.constant 0 : i32
    return %c0_i32, %c0_i32_0 : i32, i32
  }
  func.func @transform_4(%arg0: i32, %arg1: i32) -> (i32, i32) {
    %c0_i32 = arith.constant 0 : i32
    %c0_i32_0 = arith.constant 0 : i32
    %c0_i32_1 = arith.constant 0 : i32
    return %c0_i32, %c0_i32_0 : i32, i32
  }
  func.func @transform_5(%arg0: i32, %arg1: i32) -> (i32, i32) {
    %c0_i32 = arith.constant 0 : i32
    %c0_i32_0 = arith.constant 0 : i32
    return %c0_i32, %arg1 : i32, i32
  }
  func.func @transform_6(%arg0: i32, %arg1: i32) -> (i32, i32) {
    %c0_i32 = arith.constant 0 : i32
    %c0_i32_0 = arith.constant 0 : i32
    return %c0_i32, %arg1 : i32, i32
  }
  func.func @transform_7(%arg0: i32, %arg1: i32) -> (i32, i32) {
    %c0_i32 = arith.constant 0 : i32
    return %arg0, %arg1 : i32, i32
  }
}

</mosaic_0001>

<bundles_post_ra>
// kernel: layer_decoder_forward.1
= control target key start
LH: loop header
LB: loop body
LE: loop exit
PB: predicated region body
PF: predicated region fallthrough
CT: control target
= control target key end

     0   :  { %s1269_s0 = inlined_call_operand.vmem [shape: bf16[32,32], index: 0, kind: input, shape index: {}]   ;;  %s1270_s1 = inlined_call_operand.vmem [shape: bf16[32,32], index: 1, kind: input, shape index: {}]   ;;  %s1271_s2 = inlined_call_operand.vmem [shape: f32[1,32], index: 2, kind: input, shape index: {}]   ;;  %s1272_s3 = inlined_call_operand.vmem [shape: f32[1,32], index: 3, kind: input, shape index: {}]   ;;  %s1273_s4 = inlined_call_operand.vmem [shape: f32[1,32], index: 4, kind: input, shape index: {}]   ;;  %s1274_s5 = inlined_call_operand.vmem [shape: bf16[32,256], index: 5, kind: input, shape index: {}]   ;;  %s1275_s6 = inlined_call_operand.vmem [shape: f32[1,256], index: 6, kind: input, shape index: {}]   ;;  %s1276_s7 = inlined_call_operand.hbm [shape: f32[32,256], index: 7, kind: output, shape index: {}]  }
   0x1   :  { %1283 = sst [smem:[#allocation13_spill]] %s1274_s5 }
   0x2   :  { %12 = vsyncpa [#allocation5], 0 }
   0x3   :  { %14 = vsyncpa [#allocation5 + $0x1], 0  ;;  %s1047_s24 = smov 0   ;;  %s1049_s25 = smov 0  }
   0x4   :  { %s1051_s26 = smov 0   ;;  %s1053_s27 = smov 0  }
   0x5   :  { %s1055_s28 = smov 0   ;;  %s1057_s29 = smov 0  }
   0x6   :  { %s1059_s30 = smov 0   ;;  %s1061_s8 = smov 0  }
   0x7   :  { %s1063_s9 = smov 0   ;;  %s1065_s10 = smov 0  }
   0x8 LB: > { %1284 = sst [smem:[#allocation7_spill]] %s977_s28  ;;  %s724_s11 = sadd.s32 4294967295, %s997_s10   ;;  %s997_s10 = sphi %s1065_s10, %s20_s10   ;;  %s993_s9 = sphi %s1063_s9, %s1300_s9   ;;  %s989_s8 = sphi %s1061_s8, %s1299_s8   ;;  %s985_s30 = sphi %s1059_s30, %s1298_s30   ;;  %s981_s29 = sphi %s1057_s29, %s1297_s29   ;;  %s977_s28 = sphi %s1055_s28, %s1296_s28   ;;  %s973_s27 = sphi %s1053_s27, %s1295_s27   ;;  %s969_s26 = sphi %s1051_s26, %s1303_s26   ;;  %s965_s25 = sphi %s1049_s25, %s1302_s25   ;;  %s961_s24 = sphi %s1047_s24, %s1301_s24  }
   0x9   : > { %1285 = sst [smem:[#allocation8_spill]] %s989_s8  ;;  %s725_s12 = sadd.s32 4294967294, %s997_s10  }
   0xa   : > { %1286 = sst [smem:[#allocation9_spill]] %s993_s9  ;;  %s29_s13 = sadd.s32 1, %s989_s8 }
   0xb   : > { %s32_s14 = sadd.s32 1, %s993_s9  ;;  %p30_p0 = scmp.ge.s32.totalorder %s29_s13, 2 }
   0xc   : > { %s149_s15 = sadd.s32 1, %s977_s28  ;;  %p156_p1 = scmp.ne.s32.totalorder %s977_s28, %s973_s27 }
   0xd   : > { %p157_p2 = scmp.eq.s32.totalorder %s997_s10, 0  ;;  %s1305_s13 = smov (%p30_p0, %s29_s13), 0 }
   0xe   : > { %1287 = sst [smem:[#allocation10_spill]] %s1305_s13  ;;  %s1307_s14 = smov (!%p30_p0, %s32_s14), %s993_s9 }
   0xf   : > { %s146_s16 = ssub.s32 %s989_s8, %s1305_s13  ;;  %p1110_p3 = por %p157_p2, %p156_p1 }
  0x10   : > { %p34_p4 = scmp.ge.s32.totalorder %s1307_s14, 2  ;;  %p147_p5 = scmp.eq.s32.totalorder %s146_s16, 0 }
  0x11   : > { %s203_s18 = sadd.s32 1, %s969_s26  ;;  %p213_p6 = scmp.ne.s32.totalorder %s969_s26, %s965_s25 }
  0x12   : > { %s1309_s14 = smov (%p34_p4, %s1307_s14), 0  ;;  %p214_p7 = scmp.eq.s32.totalorder %s724_s11, 3 }
  0x13   : > { %1289 = sst [smem:[#allocation11_spill]] %s1309_s14  ;;  %s198_s20 = ssub.s32 %s993_s9, %s1309_s14 }
  0x14   : > { %s1120_s19 = scalar_select %p147_p5, %s977_s28, %s149_s15  }
  0x15   : > { %s200_s21 = sor.u32 %s198_s20, %s146_s16  ;;  %p219_p8 = scmp.ne.s32.totalorder %s965_s25, %s961_s24 }
  0x16   : > { %1290 = sst [smem:[#allocation12_spill]] %s1120_s19  ;;  %p201_p9 = scmp.eq.s32.totalorder %s200_s21, 0 }
  0x17   : > { %p1126_p10 = por %p214_p7, %p213_p6  ;;  %p220_p11 = scmp.eq.s32.totalorder %s725_s12, 3 }
  0x18   : > { %s1131_s23 = scalar_select %p201_p9, %s969_s26, %s203_s18  }
  0x19   : > { %p1133_p12 = por %p220_p11, %p219_p8  ;;  %p727_p13 = scmp.ge.s32.totalorder %s997_s10, 4 }
  0x1b   : > { %248 = sbr.rel (%p727_p13) target bundleno = 44 (0x2c), region = 32 }
  0x20   : > { %260 = sbr.rel (!%p1110_p3) target bundleno = 44 (0x2c), region = 40  ;;  %s262_s11 = sand.u32 (%p1110_p3), 1, %s977_s28  }
  0x21   : > { %s729_s15 = sshll.u32 (%p1110_p3), %s989_s8, 2  ;;  %s728_s16 = sshll.u32 (%p1110_p3), %s262_s11, 4 }
  0x22   : > { %s1293_s5 = sld [smem:[#allocation13_spill]] (%p1110_p3)  ;;  %s264_s18 = scalar_lea.vmem (%p1110_p3), [#allocation3], %s728_s16 }
  0x28   : > { %s266_s12 = scalar_lea.vmem %s1293_s5, %s729_s15 }
  0x29   : > { %v283_v0 = vld [vmem:[%s266_s12] sm:$0xf]  ;;  %v285_v1 = vld [vmem:[%s266_s12 + $0x8] sm:$0xf]  ;;  %v287_v2 = vld [vmem:[%s266_s12 + $0x10] sm:$0xf] }
  0x2a   : > { %284 = vst [vmem:[%s264_s18] sm:$0xf] %v283_v0  ;;  %286 = vst [vmem:[%s264_s18 + $0x4] sm:$0xf] %v285_v1  ;;  %v289_v3 = vld [vmem:[%s266_s12 + $0x18] sm:$0xf] }
  0x2b   : > { %288 = vst [vmem:[%s264_s18 + $0x8] sm:$0xf] %v287_v2  ;;  %290 = vst [vmem:[%s264_s18 + $0xc] sm:$0xf] %v289_v3 }
  0x2c PF: > { %p730_p0 = scmp.ge.s32.totalorder %s997_s10, 1  ;;  %p327_p1 = scmp.lt.s32.totalorder %s997_s10, 5 }
  0x2e   : > { %p328_p2 = pnand %p730_p0, %p327_p1 }
  0x2f   : > { %s334_s17 = sand.u32 (!%p328_p2), 1, %s973_s27   ;;  %s1281_s11 = sand.u32 (!%p328_p2), 1, %s965_s25  }
  0x30   : > { %331 = sbr.rel (%p328_p2) target bundleno = 821 (0x335), region = 85  ;;  %s1149_s15 = sshll.u32 (!%p328_p2), %s334_s17, 4 }
  0x31   : > { %s732_s16 = sshll.u32 (!%p328_p2), %s1281_s11, 4  ;;  %s733_s20 = sshll.u32 (!%p328_p2), %s985_s30, 1 }
  0x32   : > { %p379_p3 = scmp.lt.s32.totalorder (!%p328_p2), %s981_s29, 1  ;;  %p374_p4 = scmp.lt.s32.totalorder (!%p328_p2), %s733_s20, 3 }
  0x33   : > { %s336_s8 = scalar_lea.vmem (!%p328_p2), [#allocation3], %s1149_s15  ;;  %s1166_s19 = scalar_lea.vmem (!%p328_p2), [#allocation4], %s732_s16 }
  0x34   : > { %p735_p5 = scmp.ne.s32.totalorder (!%p328_p2), %s981_s29, 0 }
  0x35   : > { %s1156_s21 = scalar_select %p379_p3, %s981_s29, 1 }
  0x36   : > { %s1311_s20 = smov (!%p374_p4, %s733_s20), 3  ;;  %387 = sbr.rel (%p735_p5) target bundleno = 598 (0x256), region = 93 }
  0x37   : > { %s381_s5 = scalar_lea.vmem %s1275_s6, %s1156_s21  ;;  %s734_s14 = sshll.u32 %s1311_s20, 2 }
  0x38   : > { %s377_s17 = scalar_lea.vmem %s1269_s0, %s734_s14 }
  0x3b   : > { %v875_v4 = vld [vmem:[%s1270_s1 + $0x8] sm:$0xff]   ;;  %v999_v5 = vmov 0.0   ;;  %v876_v6 = vld [vmem:[%s1270_s1] sm:$0xff]   ;;  %vm1000_vm0 = vmmov 0   ;;  %vm418_vm1 = vcmask 261120   ;;  %vm526_vm2 = vcmask 257024  }
  0x3c   : > { %765 = vmatprep.subr.bf16.mxu0 %v999_v5  ;;  %769 = vmatprep.mubr.msk.bf16.mxu0 %vm1000_vm0, %v999_v5  ;;  %v877_v7 = vld [vmem:[%s377_s17] sm:$0xff]  }
  0x3d   : > { %766 = vmatpush3.bf16.msra.mxu0 %v875_v4  ;;  %v736_v8 = vld [vmem:[%s1271_s2] ss:$0 sm:$0xff] }
  0x3e   : > { %767 = vmatprep.subr.bf16.mxu0 %v999_v5  ;;  %v741_v44 = vld [vmem:[%s1272_s3] ss:$0 sm:$0xff] }
  0x3f   : > { %v742_v46 = vld [vmem:[%s1273_s4] ss:$0 sm:$0xff] }
  0x41   : > { %768 = vmatpush3.bf16.msra.mxu0 %v876_v6 }
  0x44   : > { %770 = vmatmul.mubr.msk.bf16.vlgmr.msra.gmra.mxu0 %vm418_vm1, %v877_v7 }
 0x104   : > { %v456_v9 = vpop.f32.mrf.mxu0 }
 0x105   : > { %v457_v10 = vadd.f32 %v736_v8, %v456_v9 }
 0x106   : > { %v771_v11 = vpop.f32.mrf.mxu0 }
 0x107   : > { %v465_v12 = vmul.f32 0.70710677, %v457_v10  ;;  %v463_v18 = vmul.f32 0.5, %v457_v10 }
 0x108   : > { %v459_v13 = vpop.f32.mrf.mxu0 }
 0x109   : > { %878 = verf.f32 %v465_v12  ;;  %v460_v14 = vadd.f32 %v736_v8, %v459_v13 }
 0x10a   : > { %v772_v15 = vpop.f32.mrf.mxu0 }
 0x10b   : > { %v466_v16 = vmul.f32 0.70710677, %v460_v14  ;;  %v464_v22 = vmul.f32 0.5, %v460_v14 }
 0x10d   : > { %880 = verf.f32 %v466_v16 }
 0x116   : > { %v879_v17 = vpop.eup %878 }
 0x117   : > { %v469_v19 = vadd.f32 1.0, %v879_v17 }
 0x119   : > { %v471_v20 = vmul.f32 %v469_v19, %v463_v18 }
 0x11a   : > { %v881_v21 = vpop.eup %880 }
 0x11b   : > { %v475_v23 = vsel %vm418_vm1, %v471_v20, 0.0  ;;  %v470_v24 = vadd.f32 1.0, %v881_v21 }
 0x11c   : > { %476 = vadd.xlane.f32.xlu0 %v475_v23 }
 0x11d   : > { %v472_v25 = vmul.f32 %v470_v24, %v464_v22 }
 0x11f   : > { %v478_v26 = vsel %vm418_vm1, %v472_v25, 0.0 }
 0x120   : > { %479 = vadd.xlane.f32.xlu0 %v478_v26 }
 0x1a5   : > { %v477_v27 = vpop.xlane.xlu0 %476 }
 0x1a6   : > { %v482_v28 = vmul.f32 0.03125, %v477_v27 }
 0x1a8   : > { %v484_v29 = vsub.f32 %v471_v20, %v482_v28 }
 0x1a9   : > { %v480_v30 = vpop.xlane.xlu0 %479 }
 0x1aa   : > { %v483_v31 = vmul.f32 0.03125, %v480_v30  ;;  %v486_v32 = vmul.f32 %v484_v29, %v484_v29 }
 0x1ac   : > { %v485_v33 = vsub.f32 %v472_v25, %v483_v31  ;;  %v488_v34 = vsel %vm418_vm1, %v486_v32, 0.0 }
 0x1ad   : > { %489 = vadd.xlane.f32.xlu1 %v488_v34 }
 0x1ae   : > { %v487_v35 = vmul.f32 %v485_v33, %v485_v33 }
 0x1b0   : > { %v491_v36 = vsel %vm418_vm1, %v487_v35, 0.0 }
 0x1b1   : > { %492 = vadd.xlane.f32.xlu1 %v491_v36 }
 0x236   : > { %v490_v37 = vpop.xlane.xlu1 %489 }
 0x237   : > { %v494_v38 = vmul.f32 0.03125, %v490_v37 }
 0x239   : > { %v496_v39 = vadd.f32 1e-12, %v494_v38 }
 0x23a   : > { %v493_v40 = vpop.xlane.xlu1 %492 }
 0x23b   : > { %882 = vrsqrt.f32 %v496_v39  ;;  %v495_v41 = vmul.f32 0.03125, %v493_v40 }
 0x23d   : > { %v497_v42 = vadd.f32 1e-12, %v495_v41 }
 0x23f   : > { %884 = vrsqrt.f32 %v497_v42 }
 0x248   : > { %v883_v43 = vpop.eup %882 }
 0x249   : > { %v500_v45 = vmul.f32 %v883_v43, %v484_v29 }
 0x24b   : > { %v508_v47 = vmul.f32 %v741_v44, %v500_v45 }
 0x24c   : > { %v885_v48 = vpop.eup %884 }
 0x24d   : > { %v516_v49 = vadd.f32 %v742_v46, %v508_v47  ;;  %v501_v50 = vmul.f32 %v885_v48, %v485_v33 }
 0x24f   : > { %v756_v51 = vpack.c.bf16 %v516_v49, %v516_v49  ;;  %v509_v52 = vmul.f32 %v741_v44, %v501_v50 }
 0x251   : > { %527 = vst.msk [vmem:[#allocation2] sm:$0xf] %vm526_vm2, %v756_v51  ;;  %v517_v53 = vadd.f32 %v742_v46, %v509_v52 }
 0x253   : > { %v757_v54 = vpack.c.bf16 %v517_v53, %v517_v53 }
 0x255   : > { %528 = vst.msk [vmem:[#allocation2 + $0x4] sm:$0xf] %vm526_vm2, %v757_v54 }
 0x256 PF: > { %v886_v55 = vld [vmem:[%s336_s8 + $0x8] sm:$0xff]   ;;  %v1001_v56 = vmov 0.0   ;;  %v887_v57 = vld [vmem:[%s336_s8] sm:$0xff]   ;;  %vm1002_vm3 = vmmov 0   ;;  %vm559_vm4 = vcmask 261120   ;;  %s758_s27 = sshll.u32 %s985_s30, 2 }
 0x257   : > { %773 = vmatprep.subr.bf16.mxu0 %v1001_v56  ;;  %777 = vmatprep.mubr.msk.bf16.mxu0 %vm1002_vm3, %v1001_v56  ;;  %s619_s17 = sadd.s32 %s981_s29, %s758_s27  ;;  %v745_v59 = vld [vmem:[%s381_s5] ss:$0 sm:$0xff]  ;;  %s622_s15 = sshll.u32 %s1166_s19, 4  ;;  %s1207_s15 = int_to_ptr.vmem [resolvable:$true] %s622_s15 }
 0x258   : > { %774 = vmatpush3.bf16.msra.mxu0 %v886_v55  ;;  %s753_s8 = sshll.u32 %s619_s17, 7  ;;  %s1294_s5 = sand.u32 1, %s965_s25  }
 0x259   : > { %775 = vmatprep.subr.bf16.mxu0 %v1001_v56  ;;  %s1205_s28 = scalar_lea.hbm %s1276_s7, %s753_s8  ;;  %s1212_s29 = scalar_lea.sflag [#allocation5], %s1294_s5 }
 0x25a   : > { %s889_s30 = scalar_lea.vmem %s1207_s15, 256  ;;  %s1003_s21 = smov [#allocation4]  }
 0x25b   : > { %p890_p6 = scmp.ne.s32.totalorder %s1207_s15, %s889_s30  ;;  %s893_s11 = sshll.u32 %s1003_s21, 4  ;;  %s894_s11 = int_to_ptr.vmem [resolvable:$false] %s893_s11 }
 0x25c   : > { %v888_v58 = vld [vmem:[#allocation2] sm:$0xff]   ;;  %776 = vmatpush3.bf16.msra.mxu0 %v887_v57  ;;  %s895_s16 = scalar_lea.vmem %s894_s11, 512  ;;  %p896_p9 = scmp.lt.s32.totalorder %s1207_s15, %s894_s11 }
 0x25d   : > { %p891_p7 = pnand %p890_p6, %p1126_p10  ;;  %p897_p11 = scmp.lt.s32.totalorder %s895_s16, %s889_s30 }
 0x25f   : > { %778 = vmatmul.mubr.msk.bf16.vlgmr.msra.gmra.mxu0 %vm559_vm4, %v888_v58  ;;  %p892_p8 = pneg %p891_p7  ;;  %p898_p13 = por %p897_p11, %p896_p9 }
 0x261   : > { %p899_p0 = pnand %p898_p13, %p892_p8 }
 0x31f   : > { %v597_v60 = vpop.f32.mrf.mxu0 }
 0x320   : > { %v598_v61 = vadd.f32 %v745_v59, %v597_v60 }
 0x321   : > { %v779_v62 = vpop.f32.mrf.mxu0 }
 0x322   : > { %604 = vst [vmem:[%s1166_s19] sm:$0xff] %v598_v61 }
 0x323   : > { %v600_v63 = vpop.f32.mrf.mxu0 }
 0x324   : > { %v601_v0 = vadd.f32 %v745_v59, %v600_v63 }
 0x325   : > { %v780_v1 = vpop.f32.mrf.mxu0 }
 0x326   : > { %605 = vst [vmem:[%s1166_s19 + $0x8] sm:$0xff] %v601_v0 }
 0x327   : > { %902 = shalt.err (!%p899_p0)
}
 0x328   : > { %s903_s19 = scalar_lea.hbm %s1205_s28, 256  ;;  %s907_s17 = scalar_lea.hbm %s1276_s7, 1024 }
 0x329   : > { %p904_p1 = scmp.ne.s32.totalorder %s1205_s28, %s903_s19  ;;  %p908_p4 = scmp.lt.s32.totalorder %s1205_s28, %s1276_s7 }
 0x32a   : > { %p909_p5 = scmp.lt.s32.totalorder %s907_s17, %s903_s19 }
 0x32b   : > { %p905_p2 = pnand %p904_p1, %p1126_p10 }
 0x32c   : > { %p910_p6 = por %p909_p5, %p908_p4 }
 0x32d   : > { %p906_p3 = pneg %p905_p2 }
 0x32f   : > { %p911_p7 = pnand %p910_p6, %p906_p3 }
 0x331   : > { %914 = shalt.err (!%p911_p7)
}
 0x332   : > { %s1004_s8 = smov 128   ;;  %s1005_s9 = smov 256  }
 0x333   : > { %s1006_s14 = smov 8  }
 0x334   : > { %781 = dma.vmem_to_hbm [thread:$0]  (%p1126_p10), %s1207_s15, 256, %s1205_s28, %s1212_s29, %s1004_s8, %s1005_s9, %s1006_s14  }
 0x335 PF: > { %p787_p8 = scmp.ge.s32.totalorder %s997_s10, 2  ;;  %s637_s5 = sand.u32 1, %s961_s24  }
 0x336   : > { %s638_s30 = scalar_lea.sflag [#allocation5], %s637_s5 }
 0x337   : > { %p784_p9 = pnand %p787_p8, %p1133_p12 }
 0x339   : > { %p785_p11 = pneg %p784_p9 }
 0x33b   : > { %956 = dma.done.wait (%p785_p11), %s638_s30, 256  }
 0x33c   : > { %958 = vsyncadd (%p785_p11), %s638_s30, 4294967040  ;;  %s20_s10 = sadd.s32 1, %s997_s10   ;;  %s1295_s27 = sld [smem:[#allocation7_spill]] }
 0x33d   : > { %p17_p13 = scmp.ge.s32.totalorder %s20_s10, 6   ;;  %s1296_s28 = sld [smem:[#allocation12_spill]] }
 0x33e   : > { %s1297_s29 = sld [smem:[#allocation8_spill]]  ;;  %s1301_s24 = smov %s965_s25 }
 0x33f   : > { %s1298_s30 = sld [smem:[#allocation9_spill]]  ;;  %s1302_s25 = smov %s969_s26 }
 0x340   : > { %s1299_s8 = sld [smem:[#allocation10_spill]]  ;;  %s1303_s26 = smov %s1131_s23 }
 0x341   : > { %s1300_s9 = sld [smem:[#allocation11_spill]]  ;;  %19 = sbr.rel (!%p17_p13) target bundleno = 8 (0x8), region = 139 }
 0x346   :  { %643 = vsyncpa [#allocation5], 1 }
 0x347   :  { %645 = vsyncpa [#allocation5 + $0x1], 1 }

</bundles_post_ra>
